<compile_context>
chip_gen: v7x
topology: tpu7x:2x2x1
jax: 0.10.0
libtpu: 0.0.40
codegen_flags: <defaults>
</compile_context>

<pallas_src>
import functools

import jax
import jax.numpy as jnp
from jax.experimental import pallas as pl
from jax.experimental.pallas import tpu as pltpu


def _vmem_limit_bytes():
    """Generation-aware scoped-VMEM limit (v5e/v6e: ~96 MiB, v7x: ~48 MiB)."""
    try:
        cap = int(pltpu.get_tpu_info().vmem_capacity_bytes)
    except Exception:
        cap = 64 * 1024 * 1024          # conservative (v7x-sized) fallback
    return max(32 * 1024 * 1024, min(cap * 3 // 4, 100 * 1024 * 1024))


def _pick_row_tile(h, width, c_in, c_out, budget_bytes):
    """Largest row tile TH (dividing H) whose working set fits the budget.

    Block-shape rule: the flat tile length TH*W must be a multiple of 128
    (lane-dense blocks/stores) unless TH == H (full-array block).
    """
    valid = [th for th in range(1, h + 1)
             if h % th == 0 and ((th * width) % 128 == 0 or th == h)]

    def est(th):
        l = th * width
        # stacked operand + halo'd tile + double-buffered in/out + epilogue
        return 4 * (9 * c_in * l + c_in * (l + 2 * width + 2)
                    + 2 * c_in * l + 4 * c_out * l)

    fitting = [th for th in valid if est(th) <= budget_bytes]
    return max(fitting) if fitting else min(valid)


def _conv3x3_bn_lrelu_kernel(x_ref, top_ref, bot_ref, w_ref, scale_ref,
                             shift_ref, o_ref, ext_ref, stack_ref, *,
                             tile_rows, width, c_in, neg_slope):
    # x_ref:     (1, C_in, L)        L = tile_rows * W, flat row-major tile
    # top_ref:   (1, 1, C_in, W)     row above the tile (garbage when r == 0)
    # bot_ref:   (1, 1, C_in, W)     row below the tile (garbage when r == last)
    # w_ref:     (C_out, 9*C_in)     k = (ky*3 + kx)*C_in + ci
    # scale_ref: (C_out, 1)          gamma / sqrt(var + eps)
    # shift_ref: (C_out, 1)          (conv_bias - mean) * scale + beta
    # o_ref:     (1, C_out, L)
    # ext_ref:   (C_in, L + 2W + 2)  VMEM scratch: halo'd flat tile
    # stack_ref: (9*C_in, L)         VMEM scratch: stacked 9-tap operand
    f32 = jnp.float32
    r = pl.program_id(1)
    last_r = pl.num_programs(1) - 1
    l = tile_rows * width

    # Assemble the halo'd tile in flat form:
    #   ext = [1 zero | top-halo row | tile rows | bottom-halo row | 1 zero]
    # so that tap (ky, kx) of output flat index j is ext[:, ky*W + kx + j].
    ext_ref[:, 0:1] = jnp.zeros((c_in, 1), f32)
    ext_ref[:, 1:1 + width] = jnp.where(
        r == 0, 0.0, top_ref[0, 0].astype(f32))
    ext_ref[:, 1 + width:1 + width + l] = x_ref[0].astype(f32)
    ext_ref[:, 1 + width + l:1 + 2 * width + l] = jnp.where(
        r == last_r, 0.0, bot_ref[0, 0].astype(f32))
    ext_ref[:, 1 + 2 * width + l:] = jnp.zeros((c_in, 1), f32)

    # Lane masks realising the left/right image border (padding = 1).
    col = jax.lax.broadcasted_iota(jnp.int32, (1, l), 1) % width
    not_first_col = col != 0
    not_last_col = col != (width - 1)

    # Build the stacked (9*C_in, L) operand once (static lane-offset slices of
    # ext + border masks); reused by the single fused matmul below.
    for ky in range(3):
        for kx in range(3):
            off = ky * width + kx
            tap = ext_ref[:, off:off + l]               # (C_in, L)
            if kx == 0:
                tap = jnp.where(not_first_col, tap, 0.0)
            elif kx == 2:
                tap = jnp.where(not_last_col, tap, 0.0)
            t = ky * 3 + kx
            stack_ref[t * c_in:(t + 1) * c_in, :] = tap

    # One MXU matmul with K = 9*C_in, then the fused conv-bias + BatchNorm
    # affine + LeakyReLU epilogue (VPU ops, hidden under the MXU).
    acc = jnp.dot(w_ref[...], stack_ref[...], preferred_element_type=f32)
    y = acc * scale_ref[...] + shift_ref[...]
    o_ref[0] = jnp.where(y >= 0, y, neg_slope * y).astype(o_ref.dtype)


@functools.partial(jax.jit, static_argnames=("eps", "neg_slope"))
def single_conv_relu_batch_fwd(x, conv_w, conv_b, bn_gamma, bn_beta,
                               bn_mean, bn_var, *, eps=1e-5, neg_slope=0.01):
    """Conv2d(C_in, C_out, 3, stride=1, padding=1) -> BatchNorm2d -> LeakyReLU.

    Args:
      x:       (N, C_in, H, W) float32, NCHW (PyTorch layout, kept as-is).
      conv_w:  (C_out, C_in, 3, 3) float32.
      conv_b:  (C_out,) float32.
      bn_*:    (C_out,) float32 weight / bias / running_mean / running_var.
    Returns:
      (N, C_out, H, W) float32.
    """
    n, c_in, h, width = x.shape
    c_out = conv_w.shape[0]

    vmem_limit = _vmem_limit_bytes()
    tile_rows = _pick_row_tile(h, width, c_in, c_out,
                               budget_bytes=vmem_limit // 2)
    r_tiles = h // tile_rows
    l_tile = tile_rows * width
    assert tile_rows * r_tiles == h

    # Free metadata reshape: flat spatial axis on lanes, NCHW order preserved.
    x_flat = x.reshape(n, c_in, h * width)

    # Halo rows (one above / below each row tile): tiny gather (2 rows per
    # tile), not an input-sized HBM pass.  Out-of-image rows are clamped here
    # and zeroed inside the kernel.
    top_idx = jnp.maximum(jnp.arange(r_tiles) * tile_rows - 1, 0)
    bot_idx = jnp.minimum(jnp.arange(r_tiles) * tile_rows + tile_rows, h - 1)
    top_halo = jnp.transpose(x[:, :, top_idx, :], (0, 2, 1, 3))  # (N,R,Cin,W)
    bot_halo = jnp.transpose(x[:, :, bot_idx, :], (0, 2, 1, 3))  # (N,R,Cin,W)

    # Weights as a single (C_out, 9*C_in) matrix: k = (ky*3 + kx)*C_in + ci.
    w2 = jnp.transpose(conv_w, (0, 2, 3, 1)).reshape(c_out, 9 * c_in)
    w2 = w2.astype(jnp.float32)

    # Fold conv bias + inference-mode BatchNorm into a per-channel affine.
    inv_std = jax.lax.rsqrt(bn_var.astype(jnp.float32) + eps)
    scale = (bn_gamma * inv_std).reshape(c_out, 1).astype(jnp.float32)
    shift = ((conv_b - bn_mean) * bn_gamma * inv_std + bn_beta)
    shift = shift.reshape(c_out, 1).astype(jnp.float32)

    kernel = functools.partial(_conv3x3_bn_lrelu_kernel,
                               tile_rows=tile_rows, width=width, c_in=c_in,
                               neg_slope=neg_slope)

    cost = pl.CostEstimate(
        flops=2 * n * c_out * 9 * c_in * h * width,
        transcendentals=0,
        bytes_accessed=4 * (n * c_in * h * width + n * c_out * h * width
                            + 9 * c_in * c_out + 2 * c_out))

    out_flat = pl.pallas_call(
        kernel,
        out_shape=jax.ShapeDtypeStruct((n, c_out, h * width), x.dtype),
        grid_spec=pltpu.PrefetchScalarGridSpec(
            num_scalar_prefetch=0,
            grid=(n, r_tiles),
            in_specs=[
                pl.BlockSpec((1, c_in, l_tile), lambda b, r: (b, 0, r)),
                pl.BlockSpec((1, 1, c_in, width), lambda b, r: (b, r, 0, 0)),
                pl.BlockSpec((1, 1, c_in, width), lambda b, r: (b, r, 0, 0)),
                pl.BlockSpec((c_out, 9 * c_in), lambda b, r: (0, 0)),
                pl.BlockSpec((c_out, 1), lambda b, r: (0, 0)),
                pl.BlockSpec((c_out, 1), lambda b, r: (0, 0)),
            ],
            out_specs=pl.BlockSpec((1, c_out, l_tile), lambda b, r: (b, 0, r)),
            scratch_shapes=[
                pltpu.VMEM((c_in, l_tile + 2 * width + 2), jnp.float32),
                pltpu.VMEM((9 * c_in, l_tile), jnp.float32),
            ],
        ),
        compiler_params=pltpu.CompilerParams(
            dimension_semantics=("parallel", "parallel"),
            vmem_limit_bytes=vmem_limit,
        ),
        cost_estimate=cost,
    )(x_flat, top_halo, bot_halo, w2, scale, shift)

    # Free metadata reshape back to NCHW (no garbage columns, no slicing).
    return out_flat.reshape(n, c_out, h, width)


def _reference(x, conv_w, conv_b, gamma, beta, mean, var,
               eps=1e-5, neg_slope=0.01):
    y = jax.lax.conv_general_dilated(
        x, conv_w, window_strides=(1, 1), padding=((1, 1), (1, 1)),
        dimension_numbers=("NCHW", "OIHW", "NCHW"),
        precision=jax.lax.Precision.HIGHEST)
    y = y + conv_b[None, :, None, None]
    y = (y - mean[None, :, None, None]) * jax.lax.rsqrt(
        var + eps)[None, :, None, None]
    y = gamma[None, :, None, None] * y + beta[None, :, None, None]
    return jnp.where(y >= 0, y, neg_slope * y)


if __name__ == "__main__":
    key = jax.random.PRNGKey(0)
    k_x, k_w, k_b, k_g, k_be, k_m, k_v = jax.random.split(key, 7)

    N, C_IN, C_OUT, H, W = 2, 4, 8, 16, 16

    x = jax.random.normal(k_x, (N, C_IN, H, W), dtype=jnp.float32)
    bound = 1.0 / (C_IN * 9) ** 0.5            # kaiming-uniform-ish for 3x3
    conv_w = jax.random.uniform(k_w, (C_OUT, C_IN, 3, 3),
                                minval=-bound, maxval=bound, dtype=jnp.float32)
    conv_b = jax.random.uniform(k_b, (C_OUT,),
                                minval=-bound, maxval=bound, dtype=jnp.float32)
    bn_gamma = jax.random.uniform(k_g, (C_OUT,), minval=0.8, maxval=1.2,
                                  dtype=jnp.float32)
    bn_beta = 0.1 * jax.random.normal(k_be, (C_OUT,), dtype=jnp.float32)
    bn_mean = 0.1 * jax.random.normal(k_m, (C_OUT,), dtype=jnp.float32)
    bn_var = jax.random.uniform(k_v, (C_OUT,), minval=0.5, maxval=1.5,
                                dtype=jnp.float32)

    out = single_conv_relu_batch_fwd(x, conv_w, conv_b, bn_gamma, bn_beta,
                                     bn_mean, bn_var)
    out = jax.block_until_ready(out)

    ref = _reference(x, conv_w, conv_b, bn_gamma, bn_beta, bn_mean, bn_var)
    assert out.shape == (N, C_OUT, H, W), out.shape
    max_err = float(jnp.max(jnp.abs(out - ref)))
    assert jnp.allclose(out, ref, atol=2e-3, rtol=2e-3), max_err

    print("KERNEL_OK")
</pallas_src>

<mosaic_0001>
module attributes {stable_mosaic.version = 11 : i64} {
  func.func @_conv3x3_bn_lrelu_kernel(%arg0: i32, %arg1: i32, %arg2: memref<1x4x256xf32, #tpu.memory_space<vmem>>, %arg3: memref<1x1x4x16xf32, #tpu.memory_space<vmem>>, %arg4: memref<1x1x4x16xf32, #tpu.memory_space<vmem>>, %arg5: memref<8x36xf32, #tpu.memory_space<vmem>>, %arg6: memref<8x1xf32, #tpu.memory_space<vmem>>, %arg7: memref<8x1xf32, #tpu.memory_space<vmem>>, %arg8: memref<1x8x256xf32, #tpu.memory_space<vmem>>, %arg9: memref<4x290xf32, #tpu.memory_space<vmem>>, %arg10: memref<36x256xf32, #tpu.memory_space<vmem>>) attributes {dimension_semantics = [#tpu.dimension_semantics<parallel>, #tpu.dimension_semantics<parallel>], iteration_bounds = array<i64: 2, 1>, scalar_prefetch = 0 : i64, scratch_operands = 2 : i64, tpu.core_type = #tpu.core_type<tc>, window_params = [{transform_indices = @transform_0, window_bounds = array<i64: 1, 4, 256>}, {transform_indices = @transform_1, window_bounds = array<i64: 1, 1, 4, 16>}, {transform_indices = @transform_2, window_bounds = array<i64: 1, 1, 4, 16>}, {pipeline_mode = #tpu.pipeline_mode<synchronous>, transform_indices = @transform_3, window_bounds = array<i64: 8, 36>}, {pipeline_mode = #tpu.pipeline_mode<synchronous>, transform_indices = @transform_4, window_bounds = array<i64: 8, 1>}, {pipeline_mode = #tpu.pipeline_mode<synchronous>, transform_indices = @transform_5, window_bounds = array<i64: 8, 1>}, {transform_indices = @transform_6, window_bounds = array<i64: 1, 8, 256>}]} {
    %cst = arith.constant 0.000000e+00 : f32
    %0 = vector.broadcast %cst : f32 to vector<4x1xf32>
    %c0 = arith.constant 0 : index
    %c0_0 = arith.constant 0 : index
    %1 = vector.load %arg9[%c0, %c0_0] : memref<4x290xf32, #tpu.memory_space<vmem>>, vector<4x1xf32>
    tpu.vector_store %arg9[%c0, %c0_0], %0 {strides = array<i32>} : memref<4x290xf32, #tpu.memory_space<vmem>>, vector<4x1xf32>,
    %c0_i32 = arith.constant 0 : i32
    %2 = arith.cmpi eq, %arg1, %c0_i32 : i32
    %c0_1 = arith.constant 0 : index
    %c0_2 = arith.constant 0 : index
    %c0_3 = arith.constant 0 : index
    %c0_4 = arith.constant 0 : index
    %3 = vector.load %arg3[%c0_1, %c0_2, %c0_3, %c0_4] : memref<1x1x4x16xf32, #tpu.memory_space<vmem>>, vector<1x1x4x16xf32>
    %4 = vector.shape_cast %3 : vector<1x1x4x16xf32> to vector<4x16xf32>
    %cst_5 = arith.constant 0.000000e+00 : f32
    %5 = vector.broadcast %cst_5 : f32 to vector<4x16xf32>
    %6 = arith.select %2, %5, %4 : vector<4x16xf32>
    %c0_6 = arith.constant 0 : index
    %c1 = arith.constant 1 : index
    %7 = vector.load %arg9[%c0_6, %c1] : memref<4x290xf32, #tpu.memory_space<vmem>>, vector<4x16xf32>
    tpu.vector_store %arg9[%c0_6, %c1], %6 {strides = array<i32>} : memref<4x290xf32, #tpu.memory_space<vmem>>, vector<4x16xf32>,
    %c0_7 = arith.constant 0 : index
    %c0_8 = arith.constant 0 : index
    %c0_9 = arith.constant 0 : index
    %8 = vector.load %arg2[%c0_7, %c0_8, %c0_9] : memref<1x4x256xf32, #tpu.memory_space<vmem>>, vector<1x4x256xf32>
    %9 = vector.shape_cast %8 : vector<1x4x256xf32> to vector<4x256xf32>
    %c0_10 = arith.constant 0 : index
    %c17 = arith.constant 17 : index
    %10 = vector.load %arg9[%c0_10, %c17] : memref<4x290xf32, #tpu.memory_space<vmem>>, vector<4x256xf32>
    tpu.vector_store %arg9[%c0_10, %c17], %9 {strides = array<i32>} : memref<4x290xf32, #tpu.memory_space<vmem>>, vector<4x256xf32>,
    %c0_i32_11 = arith.constant 0 : i32
    %11 = arith.cmpi eq, %arg1, %c0_i32_11 : i32
    %c0_12 = arith.constant 0 : index
    %c0_13 = arith.constant 0 : index
    %c0_14 = arith.constant 0 : index
    %c0_15 = arith.constant 0 : index
    %12 = vector.load %arg4[%c0_12, %c0_13, %c0_14, %c0_15] : memref<1x1x4x16xf32, #tpu.memory_space<vmem>>, vector<1x1x4x16xf32>
    %13 = vector.shape_cast %12 : vector<1x1x4x16xf32> to vector<4x16xf32>
    %cst_16 = arith.constant 0.000000e+00 : f32
    %14 = vector.broadcast %cst_16 : f32 to vector<4x16xf32>
    %15 = arith.select %11, %14, %13 : vector<4x16xf32>
    %c0_17 = arith.constant 0 : index
    %c273 = arith.constant 273 : index
    %16 = vector.load %arg9[%c0_17, %c273] : memref<4x290xf32, #tpu.memory_space<vmem>>, vector<4x16xf32>
    tpu.vector_store %arg9[%c0_17, %c273], %15 {strides = array<i32>} : memref<4x290xf32, #tpu.memory_space<vmem>>, vector<4x16xf32>,
    %cst_18 = arith.constant 0.000000e+00 : f32
    %17 = vector.broadcast %cst_18 : f32 to vector<4x1xf32>
    %c0_19 = arith.constant 0 : index
    %c289 = arith.constant 289 : index
    %18 = vector.load %arg9[%c0_19, %c289] : memref<4x290xf32, #tpu.memory_space<vmem>>, vector<4x1xf32>
    tpu.vector_store %arg9[%c0_19, %c289], %17 {strides = array<i32>} : memref<4x290xf32, #tpu.memory_space<vmem>>, vector<4x1xf32>,
    %19 = tpu.iota {dimensions = array<i32: 1>} : vector<1x256xi32>
    %c16_i32 = arith.constant 16 : i32
    %c0_i32_20 = arith.constant 0 : i32
    %20 = arith.cmpi eq, %c16_i32, %c0_i32_20 : i32
    %c1_i32 = arith.constant 1 : i32
    %21 = arith.select %20, %c1_i32, %c16_i32 : i32
    %22 = vector.broadcast %21 : i32 to vector<1x256xi32>
    %23 = arith.remsi %19, %22 : vector<1x256xi32>
    %c0_i32_21 = arith.constant 0 : i32
    %24 = vector.broadcast %c0_i32_21 : i32 to vector<1x256xi32>
    %25 = arith.cmpi ne, %23, %24 : vector<1x256xi32>
    %c0_i32_22 = arith.constant 0 : i32
    %26 = vector.broadcast %c0_i32_22 : i32 to vector<1x256xi32>
    %27 = arith.cmpi slt, %23, %26 : vector<1x256xi32>
    %c0_i32_23 = arith.constant 0 : i32
    %28 = arith.cmpi slt, %21, %c0_i32_23 : i32
    %29 = vector.broadcast %28 : i1 to vector<1x256xi1>
    %30 = vector.broadcast %29 : vector<1x256xi1> to vector<1x256xi1>
    %31 = arith.xori %27, %30 : vector<1x256xi1>
    %32 = arith.andi %31, %25 : vector<1x256xi1>
    %33 = vector.broadcast %21 : i32 to vector<1x256xi32>
    %34 = arith.addi %23, %33 : vector<1x256xi32>
    %35 = arith.select %32, %34, %23 : vector<1x256xi1>, vector<1x256xi32>
    %c0_i32_24 = arith.constant 0 : i32
    %36 = vector.broadcast %c0_i32_24 : i32 to vector<1x256xi32>
    %37 = arith.cmpi ne, %35, %36 : vector<1x256xi32>
    %c15_i32 = arith.constant 15 : i32
    %38 = vector.broadcast %c15_i32 : i32 to vector<1x256xi32>
    %39 = arith.cmpi ne, %35, %38 : vector<1x256xi32>
    %c0_25 = arith.constant 0 : index
    %c0_26 = arith.constant 0 : index
    %40 = vector.load %arg9[%c0_25, %c0_26] : memref<4x290xf32, #tpu.memory_space<vmem>>, vector<4x256xf32>
    %cst_27 = arith.constant 0.000000e+00 : f32
    %41 = vector.shape_cast %37 : vector<1x256xi1> to vector<1x256xi1>
    %42 = vector.broadcast %41 : vector<1x256xi1> to vector<4x256xi1>
    %43 = vector.broadcast %cst_27 : f32 to vector<4x256xf32>
    %44 = arith.select %42, %40, %43 : vector<4x256xi1>, vector<4x256xf32>
    %c0_28 = arith.constant 0 : index
    %c0_29 = arith.constant 0 : index
    %45 = vector.load %arg10[%c0_28, %c0_29] : memref<36x256xf32, #tpu.memory_space<vmem>>, vector<4x256xf32>
    tpu.vector_store %arg10[%c0_28, %c0_29], %44 {strides = array<i32>} : memref<36x256xf32, #tpu.memory_space<vmem>>, vector<4x256xf32>,
    %c0_30 = arith.constant 0 : index
    %c1_31 = arith.constant 1 : index
    %46 = vector.load %arg9[%c0_30, %c1_31] : memref<4x290xf32, #tpu.memory_space<vmem>>, vector<4x256xf32>
    %c4 = arith.constant 4 : index
    %c0_32 = arith.constant 0 : index
    %47 = vector.load %arg10[%c4, %c0_32] : memref<36x256xf32, #tpu.memory_space<vmem>>, vector<4x256xf32>
    tpu.vector_store %arg10[%c4, %c0_32], %46 {strides = array<i32>} : memref<36x256xf32, #tpu.memory_space<vmem>>, vector<4x256xf32>,
    %c0_33 = arith.constant 0 : index
    %c2 = arith.constant 2 : index
    %48 = vector.load %arg9[%c0_33, %c2] : memref<4x290xf32, #tpu.memory_space<vmem>>, vector<4x256xf32>
    %cst_34 = arith.constant 0.000000e+00 : f32
    %49 = vector.shape_cast %39 : vector<1x256xi1> to vector<1x256xi1>
    %50 = vector.broadcast %49 : vector<1x256xi1> to vector<4x256xi1>
    %51 = vector.broadcast %cst_34 : f32 to vector<4x256xf32>
    %52 = arith.select %50, %48, %51 : vector<4x256xi1>, vector<4x256xf32>
    %c8 = arith.constant 8 : index
    %c0_35 = arith.constant 0 : index
    %53 = vector.load %arg10[%c8, %c0_35] : memref<36x256xf32, #tpu.memory_space<vmem>>, vector<4x256xf32>
    tpu.vector_store %arg10[%c8, %c0_35], %52 {strides = array<i32>} : memref<36x256xf32, #tpu.memory_space<vmem>>, vector<4x256xf32>,
    %c0_36 = arith.constant 0 : index
    %c16 = arith.constant 16 : index
    %54 = vector.load %arg9[%c0_36, %c16] : memref<4x290xf32, #tpu.memory_space<vmem>>, vector<4x256xf32>
    %cst_37 = arith.constant 0.000000e+00 : f32
    %55 = vector.shape_cast %37 : vector<1x256xi1> to vector<1x256xi1>
    %56 = vector.broadcast %55 : vector<1x256xi1> to vector<4x256xi1>
    %57 = vector.broadcast %cst_37 : f32 to vector<4x256xf32>
    %58 = arith.select %56, %54, %57 : vector<4x256xi1>, vector<4x256xf32>
    %c12 = arith.constant 12 : index
    %c0_38 = arith.constant 0 : index
    %59 = vector.load %arg10[%c12, %c0_38] : memref<36x256xf32, #tpu.memory_space<vmem>>, vector<4x256xf32>
    tpu.vector_store %arg10[%c12, %c0_38], %58 {strides = array<i32>} : memref<36x256xf32, #tpu.memory_space<vmem>>, vector<4x256xf32>,
    %c0_39 = arith.constant 0 : index
    %c17_40 = arith.constant 17 : index
    %60 = vector.load %arg9[%c0_39, %c17_40] : memref<4x290xf32, #tpu.memory_space<vmem>>, vector<4x256xf32>
    %c16_41 = arith.constant 16 : index
    %c0_42 = arith.constant 0 : index
    %61 = vector.load %arg10[%c16_41, %c0_42] : memref<36x256xf32, #tpu.memory_space<vmem>>, vector<4x256xf32>
    tpu.vector_store %arg10[%c16_41, %c0_42], %60 {strides = array<i32>} : memref<36x256xf32, #tpu.memory_space<vmem>>, vector<4x256xf32>,
    %c0_43 = arith.constant 0 : index
    %c18 = arith.constant 18 : index
    %62 = vector.load %arg9[%c0_43, %c18] : memref<4x290xf32, #tpu.memory_space<vmem>>, vector<4x256xf32>
    %cst_44 = arith.constant 0.000000e+00 : f32
    %63 = vector.shape_cast %39 : vector<1x256xi1> to vector<1x256xi1>
    %64 = vector.broadcast %63 : vector<1x256xi1> to vector<4x256xi1>
    %65 = vector.broadcast %cst_44 : f32 to vector<4x256xf32>
    %66 = arith.select %64, %62, %65 : vector<4x256xi1>, vector<4x256xf32>
    %c20 = arith.constant 20 : index
    %c0_45 = arith.constant 0 : index
    %67 = vector.load %arg10[%c20, %c0_45] : memref<36x256xf32, #tpu.memory_space<vmem>>, vector<4x256xf32>
    tpu.vector_store %arg10[%c20, %c0_45], %66 {strides = array<i32>} : memref<36x256xf32, #tpu.memory_space<vmem>>, vector<4x256xf32>,
    %c0_46 = arith.constant 0 : index
    %c32 = arith.constant 32 : index
    %68 = vector.load %arg9[%c0_46, %c32] : memref<4x290xf32, #tpu.memory_space<vmem>>, vector<4x256xf32>
    %cst_47 = arith.constant 0.000000e+00 : f32
    %69 = vector.shape_cast %37 : vector<1x256xi1> to vector<1x256xi1>
    %70 = vector.broadcast %69 : vector<1x256xi1> to vector<4x256xi1>
    %71 = vector.broadcast %cst_47 : f32 to vector<4x256xf32>
    %72 = arith.select %70, %68, %71 : vector<4x256xi1>, vector<4x256xf32>
    %c24 = arith.constant 24 : index
    %c0_48 = arith.constant 0 : index
    %73 = vector.load %arg10[%c24, %c0_48] : memref<36x256xf32, #tpu.memory_space<vmem>>, vector<4x256xf32>
    tpu.vector_store %arg10[%c24, %c0_48], %72 {strides = array<i32>} : memref<36x256xf32, #tpu.memory_space<vmem>>, vector<4x256xf32>,
    %c0_49 = arith.constant 0 : index
    %c33 = arith.constant 33 : index
    %74 = vector.load %arg9[%c0_49, %c33] : memref<4x290xf32, #tpu.memory_space<vmem>>, vector<4x256xf32>
    %c28 = arith.constant 28 : index
    %c0_50 = arith.constant 0 : index
    %75 = vector.load %arg10[%c28, %c0_50] : memref<36x256xf32, #tpu.memory_space<vmem>>, vector<4x256xf32>
    tpu.vector_store %arg10[%c28, %c0_50], %74 {strides = array<i32>} : memref<36x256xf32, #tpu.memory_space<vmem>>, vector<4x256xf32>,
    %c0_51 = arith.constant 0 : index
    %c34 = arith.constant 34 : index
    %76 = vector.load %arg9[%c0_51, %c34] : memref<4x290xf32, #tpu.memory_space<vmem>>, vector<4x256xf32>
    %cst_52 = arith.constant 0.000000e+00 : f32
    %77 = vector.shape_cast %39 : vector<1x256xi1> to vector<1x256xi1>
    %78 = vector.broadcast %77 : vector<1x256xi1> to vector<4x256xi1>
    %79 = vector.broadcast %cst_52 : f32 to vector<4x256xf32>
    %80 = arith.select %78, %76, %79 : vector<4x256xi1>, vector<4x256xf32>
    %c32_53 = arith.constant 32 : index
    %c0_54 = arith.constant 0 : index
    %81 = vector.load %arg10[%c32_53, %c0_54] : memref<36x256xf32, #tpu.memory_space<vmem>>, vector<4x256xf32>
    tpu.vector_store %arg10[%c32_53, %c0_54], %80 {strides = array<i32>} : memref<36x256xf32, #tpu.memory_space<vmem>>, vector<4x256xf32>,
    %c0_55 = arith.constant 0 : index
    %c0_56 = arith.constant 0 : index
    %82 = vector.load %arg5[%c0_55, %c0_56] : memref<8x36xf32, #tpu.memory_space<vmem>>, vector<8x36xf32>
    %c0_57 = arith.constant 0 : index
    %c0_58 = arith.constant 0 : index
    %83 = vector.load %arg10[%c0_57, %c0_58] : memref<36x256xf32, #tpu.memory_space<vmem>>, vector<36x256xf32>
    %cst_59 = arith.constant dense<0.000000e+00> : vector<8x256xf32>
    %84 = tpu.matmul %82, %83, %cst_59 {dimension_numbers = #tpu.dot_dimension_numbers<[1], [0], [0], [1], [0, 0, 1, 1], [], []>} : vector<8x36xf32>, vector<36x256xf32>, vector<8x256xf32> -> vector<8x256xf32>
    %c0_60 = arith.constant 0 : index
    %c0_61 = arith.constant 0 : index
    %85 = vector.load %arg6[%c0_60, %c0_61] : memref<8x1xf32, #tpu.memory_space<vmem>>, vector<8x1xf32>
    %86 = vector.broadcast %85 : vector<8x1xf32> to vector<8x256xf32>
    %87 = arith.mulf %84, %86 : vector<8x256xf32>
    %c0_62 = arith.constant 0 : index
    %c0_63 = arith.constant 0 : index
    %88 = vector.load %arg7[%c0_62, %c0_63] : memref<8x1xf32, #tpu.memory_space<vmem>>, vector<8x1xf32>
    %89 = vector.broadcast %88 : vector<8x1xf32> to vector<8x256xf32>
    %90 = arith.addf %87, %89 : vector<8x256xf32>
    %cst_64 = arith.constant 0.000000e+00 : f32
    %91 = vector.broadcast %cst_64 : f32 to vector<8x256xf32>
    %92 = arith.cmpf oge, %90, %91 : vector<8x256xf32>
    %cst_65 = arith.constant 0.00999999977 : f32
    %93 = vector.broadcast %cst_65 : f32 to vector<8x256xf32>
    %94 = arith.mulf %93, %90 : vector<8x256xf32>
    %95 = arith.select %92, %90, %94 : vector<8x256xi1>, vector<8x256xf32>
    %c0_66 = arith.constant 0 : index
    %c0_67 = arith.constant 0 : index
    %c0_68 = arith.constant 0 : index
    %96 = vector.load %arg8[%c0_66, %c0_67, %c0_68] : memref<1x8x256xf32, #tpu.memory_space<vmem>>, vector<1x8x256xf32>
    %97 = vector.shape_cast %96 : vector<1x8x256xf32> to vector<8x256xf32>
    %98 = vector.shape_cast %95 : vector<8x256xf32> to vector<1x8x256xf32>
    tpu.vector_store %arg8[%c0_66, %c0_67, %c0_68], %98 {strides = array<i32>} : memref<1x8x256xf32, #tpu.memory_space<vmem>>, vector<1x8x256xf32>,
    return
  }
  func.func @transform_0(%arg0: i32, %arg1: i32) -> (i32, i32, i32) {
    %c0_i32 = arith.constant 0 : i32
    %c0_i32_0 = arith.constant 0 : i32
    return %arg0, %c0_i32, %arg1 : i32, i32, i32
  }
  func.func @transform_1(%arg0: i32, %arg1: i32) -> (i32, i32, i32, i32) {
    %c0_i32 = arith.constant 0 : i32
    %c0_i32_0 = arith.constant 0 : i32
    %c0_i32_1 = arith.constant 0 : i32
    return %arg0, %arg1, %c0_i32, %c0_i32_0 : i32, i32, i32, i32
  }
  func.func @transform_2(%arg0: i32, %arg1: i32) -> (i32, i32, i32, i32) {
    %c0_i32 = arith.constant 0 : i32
    %c0_i32_0 = arith.constant 0 : i32
    %c0_i32_1 = arith.constant 0 : i32
    return %arg0, %arg1, %c0_i32, %c0_i32_0 : i32, i32, i32, i32
  }
  func.func @transform_3(%arg0: i32, %arg1: i32) -> (i32, i32) {
    %c0_i32 = arith.constant 0 : i32
    %c0_i32_0 = arith.constant 0 : i32
    %c0_i32_1 = arith.constant 0 : i32
    return %c0_i32, %c0_i32_0 : i32, i32
  }
  func.func @transform_4(%arg0: i32, %arg1: i32) -> (i32, i32) {
    %c0_i32 = arith.constant 0 : i32
    %c0_i32_0 = arith.constant 0 : i32
    %c0_i32_1 = arith.constant 0 : i32
    return %c0_i32, %c0_i32_0 : i32, i32
  }
  func.func @transform_5(%arg0: i32, %arg1: i32) -> (i32, i32) {
    %c0_i32 = arith.constant 0 : i32
    %c0_i32_0 = arith.constant 0 : i32
    %c0_i32_1 = arith.constant 0 : i32
    return %c0_i32, %c0_i32_0 : i32, i32
  }
  func.func @transform_6(%arg0: i32, %arg1: i32) -> (i32, i32, i32) {
    %c0_i32 = arith.constant 0 : i32
    %c0_i32_0 = arith.constant 0 : i32
    return %arg0, %c0_i32, %arg1 : i32, i32, i32
  }
}

</mosaic_0001>

<bundles_post_ra>
// kernel: single_conv_relu_batch_fwd.1
= control target key start
LH: loop header
LB: loop body
LE: loop exit
PB: predicated region body
PF: predicated region fallthrough
CT: control target
= control target key end

     0   :  { %s974_s21 = smov 0   ;;  %s976_s22 = smov 0   ;;  %s1086_s0 = inlined_call_operand.vmem [shape: f32[2,4,256], index: 0, kind: input, shape index: {}]   ;;  %s1087_s1 = inlined_call_operand.vmem [shape: f32[2,1,4,16], index: 1, kind: input, shape index: {}]   ;;  %s1088_s2 = inlined_call_operand.vmem [shape: f32[2,1,4,16], index: 2, kind: input, shape index: {}]   ;;  %s1089_s3 = inlined_call_operand.vmem [shape: f32[8,36], index: 3, kind: input, shape index: {}]   ;;  %s1090_s4 = inlined_call_operand.vmem [shape: f32[8,1], index: 4, kind: input, shape index: {}]   ;;  %s1091_s5 = inlined_call_operand.vmem [shape: f32[8,1], index: 5, kind: input, shape index: {}]   ;;  %s1092_s6 = inlined_call_operand.vmem [shape: f32[2,8,256], index: 6, kind: output, shape index: {}]  }
   0x1   :  { %s978_s1 = smov 0  }
   0x2 LB: > { %s28_s2 = sadd.s32 1, %s921_s22  ;;  %p839_p0 = scmp.ge.s32.totalorder %s925_s1, 1  ;;  %s925_s1 = sphi %s978_s1, %s16_s1   ;;  %s921_s22 = sphi %s976_s22, %s1102_s22   ;;  %s917_s21 = sphi %s974_s21, %s1101_s21  }
   0x3   : > { %p30_p1 = scmp.ge.s32.totalorder %s28_s2, 2  ;;  %p261_p2 = scmp.lt.s32.totalorder %s925_s1, 3 }
   0x5   : > { %s1104_s2 = smov (%p30_p1, %s28_s2), 0  ;;  %p262_p3 = pnand %p839_p0, %p261_p2 }
   0x6   : > { %p314_p4 = scmp.lt.s32.totalorder (!%p262_p3), %s917_s21, 1  ;;  %vm347_vm0 = vcmask (!%p262_p3), 3072   ;;  %v927_v0 = vmov (!%p262_p3), 0.0   ;;  %s928_s23 = smov (!%p262_p3), 17   ;;  %v386_v2 = vlaneseq (!%p262_p3)  ;;  %vm374_vm1 = vcmask (!%p262_p3), 134144   ;;  %v694_v28 = vld [vmem:[%s1090_s4] sm:$0xff] (!%p262_p3) }
   0x7   : > { %265 = sbr.rel (%p262_p3) target bundleno = 539 (0x21b), region = 44  ;;  %379 = vrot.lane.b32.xlu1 (!%p262_p3), %v927_v0, %s928_s23  ;;  %348 = vst.msk [vmem:[#allocation2] sm:$0xf] (!%p262_p3), %vm347_vm0, %v927_v0  ;;  %687 = vmatprep.mubr.f32.mxu0 (!%p262_p3), %v927_v0  ;;  %s929_s28 = smov (!%p262_p3), 1   ;;  %vm370_vm2 = vcmask (!%p262_p3), 1043592   ;;  %vm371_vm3 = vcmask (!%p262_p3), 1047556  }
   0x8   : > { %vm382_vm4 = vcmask (!%p262_p3), 265352   ;;  %v998_v6 = vand.u32 (!%p262_p3), 127, %v386_v2  ;;  %vm366_vm5 = vcmask (!%p262_p3), 138240   ;;  %vm359_vm6 = vcmask (!%p262_p3), 134152   ;;  %vm372_vm8 = vmor (!%p262_p3), %vm371_vm3, %vm370_vm2  ;;  %s930_s29 = smov (!%p262_p3), 112   ;;  %s931_s30 = smov (!%p262_p3), 127  }
   0x9   : > { %vm384_vm7 = vcmask (!%p262_p3), 273672   ;;  %s932_s7 = smov (!%p262_p3), 96   ;;  %s933_s8 = smov (!%p262_p3), 126   ;;  %v938_v27 = vmov (!%p262_p3), 0   ;;  %v702_v29 = vld [vmem:[%s1091_s5] sm:$0xff] (!%p262_p3)  ;;  %vm483_vm11 = vcmask (!%p262_p3), 916480  }
   0xa   : > { %v1001_v9 = vadd.s32 (!%p262_p3), 128, %v998_v6  ;;  %v393_v10 = vand.u32 (!%p262_p3), 15, %v998_v6  ;;  %s934_s9 = smov (!%p262_p3), 110   ;;  %s935_s10 = smov (!%p262_p3), 95   ;;  %897 = vset.pattern.permute.xlu1 (!%p262_p3), %v938_v27  ;;  %898 = vset.pattern.permute.xlu0 (!%p262_p3), %v938_v27  ;;  %vm441_vm12 = vcmask (!%p262_p3), 1039360   ;;  %vm553_vm13 = vcmask (!%p262_p3), 785408  }
   0xb   : > { %s936_s11 = smov (!%p262_p3), 111   ;;  %s937_s12 = smov (!%p262_p3), 94   ;;  %vm463_vm14 = vcmask (!%p262_p3), 1031168   ;;  %vm509_vm15 = vcmask (!%p262_p3), 908288   ;;  %vm527_vm2 = vcmask (!%p262_p3), 900096   ;;  %vm574_vm3 = vcmask (!%p262_p3), 777216  }
   0xc   : > { %v400_v11 = vand.u32 (!%p262_p3), 15, %v1001_v9  ;;  %vm1007_vm9 = vcmp.ne.s32.totalorder (!%p262_p3), %v393_v10, 0  ;;  %vm1043_vm0 = vcmp.ne.s32.totalorder (!%p262_p3), %v393_v10, 15 }
   0xe   : > { %s1106_s21 = smov (!%p314_p4, %s917_s21), 1  ;;  %vm1013_vm10 = vcmp.ne.s32.totalorder %v400_v11, 0 }
   0xf   : > { %s851_s24 = sshll.u32 %s1106_s21, 3  ;;  %s852_s19 = sshll.u32 %s1106_s21, 4 }
  0x10   : > { %s321_s27 = scalar_lea.vmem %s1086_s0, %s851_s24  ;;  %s345_s24 = scalar_lea.vmem %s1092_s6, %s852_s19 }
  0x11   : > { %v361_v1 = vld [vmem:[%s321_s27] sm:$0xff] }
  0x12   : > { %363 = vrot.lane.b32.xlu0 %v361_v1, %s928_s23 }
  0x16   : > { %356 = vrot.lane.b32.xlu0 %v927_v0, %s929_s28 }
  0x79   : > { %v380_v5 = vpop.permute.xlu1 %379 }
  0x84   : > { %v364_v3 = vpop.permute.xlu0 %363 }
  0x85   : > { %v365_v4 = vrot.slane %v364_v3, 4 }
  0x87   : > { %375 = vst.msk [vmem:[#allocation2 + $0x8] sm:$0xf] %vm374_vm1, %v365_v4  ;;  %v367_v8 = vsel %vm366_vm5, %v365_v4, %v364_v3  ;;  %vm1049_vm1 = vcmp.ne.s32.totalorder %v400_v11, 15  ;;  %vm616_vm5 = vcmask 1043456  }
  0x88   : > { %v357_v7 = vpop.permute.xlu0 %356  ;;  %383 = vst.msk [vmem:[#allocation2 + $0x8] sm:$0xf] %vm382_vm4, %v380_v5  ;;  %vm592_vm4 = vcmask 769024  }
  0x89   : > { %360 = vst.msk [vmem:[#allocation2] sm:$0xf] %vm359_vm6, %v357_v7  ;;  %vm612_vm6 = vcmask 293888  }
  0x8a   : > { %385 = vst.msk [vmem:[#allocation2 + $0x8] sm:$0xf] %vm384_vm7, %v927_v0 }
  0x8b   : > { %373 = vst.msk [vmem:[#allocation2] sm:$0xff] %vm372_vm8, %v367_v8 }
  0x91   : > { %v449_v18 = vld [vmem:[#allocation2 + $0x8] sm:$0xf] }
  0x92   : > { %v472_v13 = vld [vmem:[#allocation2] sm:$0xff]  ;;  %v517_v19 = vld [vmem:[#allocation2 + $0x8] sm:$0xf] }
  0x93   : > { %477 = vrot.lane.b32.xlu1 %v472_v13, %s930_s29  ;;  %v476_v15 = vcombine.high %v472_v13, %v472_v13  ;;  %437 = vrot.lane.b32.xlu0 %v472_v13, %s931_s30  ;;  %v425_v16 = vsel %vm1007_vm9, %v472_v13, 0.0  ;;  %v473_v20 = vld [vmem:[#allocation2 + $0x8] sm:$0xf]  ;;  %v433_v22 = vcombine.low %v472_v13, %v472_v13 }
  0x94   : > { %427 = vst [vmem:[#allocation3] sm:$0xf] %v425_v16  ;;  %v543_v21 = vld [vmem:[#allocation2 + $0x8] sm:$0xf] }
  0x95   : > { %v426_v17 = vsel %vm1013_vm10, %v476_v15, 0.0  ;;  %v499_v23 = vld [vmem:[#allocation2 + $0x8] sm:$0xf] }
  0x96   : > { %428 = vst [vmem:[#allocation3 + $0x8] sm:$0xf] %v426_v17  ;;  %v901_v24 = vld [vmem:[#allocation2 + $0x8] ss:$0 sps:$4 sm:$0xff]  }
  0x97   : > { %547 = vrot.lane.b32.xlu1 %v472_v13, %s932_s7  ;;  %457 = vrot.lane.b32.xlu0 %v472_v13, %s933_s8  ;;  %v902_v25 = vld [vmem:[#allocation2 + $0x8] ss:$0 sps:$4 sm:$0xff]  }
  0x98   : > { %v582_v26 = vld [vmem:[#allocation2 + $0x8] sm:$0xf] }
  0x9b   : > { %461 = vrot.lane.b32.xlu1 %v449_v18, %s933_s8  ;;  %521 = vrot.lane.b32.xlu0 %v472_v13, %s934_s9 }
  0x9f   : > { %525 = vrot.lane.b32.xlu1 %v517_v19, %s934_s9  ;;  %570 = vrot.lane.b32.xlu0 %v472_v13, %s935_s10 }
  0xa3   : > { %479 = vrot.lane.b32.xlu1 %v476_v15, %s930_s29  ;;  %481 = vrot.lane.b32.xlu0 %v473_v20, %s930_s29 }
  0xa7   : > { %551 = vrot.lane.b32.xlu0 %v543_v21, %s932_s7  ;;  %435 = vrot.lane.b32.xlu1 %v433_v22, %s931_s30 }
  0xab   : > { %507 = vrot.lane.b32.xlu0 %v499_v23, %s936_s11  ;;  %549 = vrot.lane.b32.xlu1 %v476_v15, %s932_s7 }
  0xaf   : > { %459 = vrot.lane.b32.xlu0 %v476_v15, %s933_s8  ;;  %505 = vrot.lane.b32.xlu1 %v476_v15, %s936_s11 }
  0xb3   : > { %523 = vrot.lane.b32.xlu0 %v476_v15, %s934_s9  ;;  %439 = vrot.lane.b32.xlu1 %v901_v24, %s931_s30 }
  0xb7   : > { %503 = vrot.lane.b32.xlu0 %v472_v13, %s936_s11  ;;  %572 = vrot.lane.b32.xlu1 %v902_v25, %s935_s10 }
  0xbb   : > { %588 = vrot.lane.b32.xlu0 %v476_v15, %s937_s12  ;;  %568 = vrot.lane.b32.xlu1 %v433_v22, %s935_s10 }
  0xbf   : > { %586 = vrot.lane.b32.xlu0 %v472_v13, %s937_s12  ;;  %590 = vrot.lane.b32.xlu1 %v582_v26, %s937_s12 }
  0xc3   : > { %697 = vperm.xlu1 %897, %v694_v28   ;;  %705 = vperm.xlu0 %898, %v702_v29  }
 0x105   : > { %v478_v30 = vpop.permute.xlu1 %477  ;;  %v438_v31 = vpop.permute.xlu0 %437 }
 0x109   : > { %v548_v32 = vpop.permute.xlu1 %547  ;;  %v458_v33 = vpop.permute.xlu0 %457 }
 0x10d   : > { %v462_v34 = vpop.permute.xlu1 %461  ;;  %v522_v35 = vpop.permute.xlu0 %521 }
 0x111   : > { %v526_v36 = vpop.permute.xlu1 %525  ;;  %v1030_v37 = vpop.permute.xlu0 %570 }
 0x115   : > { %v480_v38 = vpop.permute.xlu1 %479  ;;  %v482_v39 = vpop.permute.xlu0 %481 }
 0x116   : > { %v484_v40 = vsel %vm483_vm11, %v478_v30, %v480_v38  ;;  %v485_v41 = vsel %vm483_vm11, %v480_v38, %v482_v39 }
 0x117   : > { %v488_v42 = vsel %vm1007_vm9, %v484_v40, 0.0  ;;  %v489_v43 = vsel %vm1013_vm10, %v485_v41, 0.0 }
 0x118   : > { %v492_v44 = vrot.slane %v488_v42, 4  ;;  %v493_v45 = vrot.slane %v489_v43, 4 }
 0x119   : > { %v552_v46 = vpop.permute.xlu0 %551  ;;  %v436_v47 = vpop.permute.xlu1 %435 }
 0x11a   : > { %496 = vst [vmem:[#allocation3 + $0x10] sm:$0xf0] %v492_v44  ;;  %497 = vst [vmem:[#allocation3 + $0x18] sm:$0xf0] %v493_v45  ;;  %v442_v48 = vsel %vm441_vm12, %v436_v47, %v438_v31 }
 0x11b   : > { %446 = vst [vmem:[#allocation3] sm:$0xf0] %v442_v48 }
 0x11d   : > { %v508_v49 = vpop.permute.xlu0 %507  ;;  %v550_v50 = vpop.permute.xlu1 %549 }
 0x11e   : > { %v554_v51 = vsel %vm553_vm13, %v548_v32, %v550_v50  ;;  %v555_v52 = vsel %vm553_vm13, %v550_v50, %v552_v46 }
 0x11f   : > { %v558_v53 = vsel %vm1007_vm9, %v554_v51, 0.0  ;;  %v559_v54 = vsel %vm1013_vm10, %v555_v52, 0.0 }
 0x120   : > { %560 = vst [vmem:[#allocation3 + $0x30] sm:$0xf] %v558_v53  ;;  %561 = vst [vmem:[#allocation3 + $0x38] sm:$0xf] %v559_v54 }
 0x121   : > { %v460_v57 = vpop.permute.xlu0 %459  ;;  %v506_v58 = vpop.permute.xlu1 %505 }
 0x122   : > { %v464_v59 = vsel %vm463_vm14, %v458_v33, %v460_v57  ;;  %v465_v60 = vsel %vm463_vm14, %v460_v57, %v462_v34  ;;  %v511_v61 = vsel %vm509_vm15, %v506_v58, %v508_v49  ;;  %v602_v20 = vld [vmem:[#allocation3] sm:$0xff] }
 0x123   : > { %v468_v62 = vsel %vm1043_vm0, %v464_v59, 0.0  ;;  %v469_v63 = vsel %vm1049_vm1, %v465_v60, 0.0  ;;  %515 = vst [vmem:[#allocation3 + $0x28] sm:$0xf] %v511_v61 }
 0x124   : > { %470 = vst [vmem:[#allocation3 + $0x10] sm:$0xf] %v468_v62  ;;  %471 = vst [vmem:[#allocation3 + $0x18] sm:$0xf] %v469_v63 }
 0x125   : > { %v524_v0 = vpop.permute.xlu0 %523  ;;  %v440_v1 = vpop.permute.xlu1 %439 }
 0x126   : > { %v528_v2 = vsel %vm527_vm2, %v522_v35, %v524_v0  ;;  %v529_v3 = vsel %vm527_vm2, %v524_v0, %v526_v36  ;;  %v443_v4 = vsel %vm441_vm12, %v438_v31, %v440_v1  ;;  %v601_v36 = vld [vmem:[%s1089_s3] sm:$0xff] }
 0x127   : > { %v532_v5 = vsel %vm1043_vm0, %v528_v2, 0.0  ;;  %v533_v6 = vsel %vm1049_vm1, %v529_v3, 0.0  ;;  %447 = vst [vmem:[#allocation3 + $0x8] sm:$0xf0] %v443_v4 }
 0x128   : > { %v536_v7 = vrot.slane %v532_v5, 4  ;;  %v537_v8 = vrot.slane %v533_v6, 4 }
 0x129   : > { %v504_v9 = vpop.permute.xlu0 %503  ;;  %v573_v10 = vpop.permute.xlu1 %572 }
 0x12a   : > { %540 = vst [vmem:[#allocation3 + $0x20] sm:$0xf0] %v536_v7  ;;  %541 = vst [vmem:[#allocation3 + $0x28] sm:$0xf0] %v537_v8  ;;  %v510_v11 = vsel %vm509_vm15, %v504_v9, %v506_v58  ;;  %v576_v12 = vsel %vm574_vm3, %v1030_v37, %v573_v10 }
 0x12b   : > { %514 = vst [vmem:[#allocation3 + $0x20] sm:$0xf] %v510_v11  ;;  %580 = vst [vmem:[#allocation3 + $0x38] sm:$0xf0] %v576_v12  ;;  %v604_v15 = vld [vmem:[#allocation3 + $0x10] sm:$0xff]  ;;  %v605_v18 = vld [vmem:[#allocation3 + $0x18] sm:$0xff] }
 0x12c   : > { %v855_v21 = vpack.c.bf16 %v604_v15, %v602_v20 }
 0x12d   : > { %v589_v13 = vpop.permute.xlu0 %588  ;;  %v569_v14 = vpop.permute.xlu1 %568 }
 0x12e   : > { %v575_v16 = vsel %vm574_vm3, %v569_v14, %v1030_v37  ;;  %v603_v17 = vld [vmem:[#allocation3 + $0x8] sm:$0xff] }
 0x12f   : > { %579 = vst [vmem:[#allocation3 + $0x30] sm:$0xf0] %v575_v16  ;;  %v853_v19 = vpack.c.bf16 %v605_v18, %v603_v17 }
 0x131   : > { %v587_v22 = vpop.permute.xlu0 %586  ;;  %v591_v23 = vpop.permute.xlu1 %590  ;;  %854 = vmatprep.subr.bf16.mxu0 %v853_v19  ;;  %v607_v24 = vld [vmem:[#allocation3 + $0x28] sm:$0xff] }
 0x132   : > { %v593_v25 = vsel %vm592_vm4, %v587_v22, %v589_v13  ;;  %v594_v26 = vsel %vm592_vm4, %v589_v13, %v591_v23  ;;  %856 = vmatpush1.bf16.msra.mxu0 %v855_v21  ;;  %v609_v27 = vld [vmem:[#allocation3 + $0x38] sm:$0xff]  ;;  %v606_v31 = vld [vmem:[#allocation3 + $0x20] sm:$0xff] }
 0x133   : > { %v597_v28 = vsel %vm1043_vm0, %v593_v25, 0.0  ;;  %v598_v29 = vsel %vm1049_vm1, %v594_v26, 0.0  ;;  %v857_v30 = vpack.c.bf16 %v609_v27, %v607_v24 }
 0x134   : > { %599 = vst [vmem:[#allocation3 + $0x40] sm:$0xf] %v597_v28  ;;  %600 = vst [vmem:[#allocation3 + $0x48] sm:$0xf] %v598_v29 }
 0x135   : > { %858 = vmatprep.subr.bf16.mxu0 %v857_v30 }
 0x136   : > { %v608_v32 = vld [vmem:[#allocation3 + $0x30] sm:$0xff] }
 0x137   : > { %v859_v33 = vpack.c.bf16 %v608_v32, %v606_v31 }
 0x139   : > { %860 = vmatpush1.bf16.msra.mxu0 %v859_v33 }
 0x13b   : > { %v611_v34 = vld [vmem:[#allocation3 + $0x48] sm:$0xf]  ;;  %v610_v35 = vld [vmem:[#allocation3 + $0x40] sm:$0xf] }
 0x13c   : > { %846 = vmatprep.subr.msk.mxu0 %vm616_vm5, %v611_v34 }
 0x13d   : > { %847 = vmatpush1.msk.msra.mxu0 %vm616_vm5, %v610_v35 }
 0x13e   : > { %848 = vmatmul.mubr.msk.f32.vlgmr.msra.gmra.mrb[0].mxu0 %vm612_vm6, %v601_v36 }
 0x142   : > { %v698_v37 = vpop.permute.xlu1 %697  ;;  %v706_v39 = vpop.permute.xlu0 %705 }
 0x211   : > { %v689_v38 = vpop.f32.mrb[0].mxu0 }
 0x212   : > { %v700_v40 = vmul.f32 %v698_v37, %v689_v38  ;;  %v691_v41 = vpop.f32.mrb[1].mxu0 }
 0x213   : > { %v701_v42 = vmul.f32 %v698_v37, %v691_v41 }
 0x214   : > { %v708_v43 = vadd.f32 %v706_v39, %v700_v40 }
 0x215   : > { %v709_v44 = vadd.f32 %v706_v39, %v701_v42 }
 0x216   : > { %vm710_vm7 = vcmp.ge.f32.partialorder %v708_v43, 0.0  ;;  %v712_v45 = vmul.f32 0.01, %v708_v43 }
 0x217   : > { %vm711_vm8 = vcmp.ge.f32.partialorder %v709_v44, 0.0  ;;  %v713_v46 = vmul.f32 0.01, %v709_v44 }
 0x218   : > { %v714_v47 = vsel %vm710_vm7, %v708_v43, %v712_v45 }
 0x219   : > { %v715_v48 = vsel %vm711_vm8, %v709_v44, %v713_v46  ;;  %716 = vst [vmem:[%s345_s24] sm:$0xff] %v714_v47 }
 0x21a   : > { %717 = vst [vmem:[%s345_s24 + $0x8] sm:$0xff] %v715_v48 }
 0x21b PF: > { %s16_s1 = sadd.s32 1, %s925_s1   ;;  %s1101_s21 = smov %s921_s22 }
 0x21c   : > { %p13_p5 = scmp.ge.s32.totalorder %s16_s1, 4   ;;  %s1102_s22 = smov %s1104_s2 }
 0x21e   :  { %15 = sbr.rel (!%p13_p5) target bundleno = 2 (0x2), region = 80 }

</bundles_post_ra>
